<compile_context>
chip_gen: v7x
topology: tpu7x:2x2x1
jax: 0.10.0
libtpu: 0.0.40
codegen_flags: <defaults>
</compile_context>

<pallas_src>
import jax
import jax.numpy as jnp
from jax import lax
from jax.experimental import pallas as pl
from jax.experimental.pallas import tpu as pltpu


def _make_nmf_kernel(S, ts, chunked):
    """Builds the kernel body for static (S, ts, chunked)."""
    chunks = ts // 128 if chunked else 1
    needs_mask = (S % ts) != 0  # only possible on the chunked path

    def kernel(x_ref, ht_ref, emb_ref, acc_ref):
        # x_ref:   (tn, C, ts)        lane-dense spatial tile of flattened NCHW input
        # ht_ref:  (C, K)             pre-transposed projection weight (H.T)
        # emb_ref: (tn, K)            output embedding tile (resident across S axis)
        # acc_ref: (tn, C, 128)|(tn,C) running spatial max (VMEM scratch)
        s = pl.program_id(1)
        last = pl.num_programs(1) - 1

        @pl.when(s == 0)
        def _init():
            acc_ref[...] = jnp.full(acc_ref.shape, -jnp.inf, acc_ref.dtype)

        if chunked:
            # VPU-only per-tile reduction: 128-lane-wide element-wise maxima.
            def accumulate(get_chunk):
                acc = acc_ref[...]
                for g in range(chunks):
                    acc = jnp.maximum(acc, get_chunk(g))
                acc_ref[...] = acc

            if needs_mask:
                @pl.when(s != last)
                def _body():
                    accumulate(lambda g: x_ref[:, :, g * 128:(g + 1) * 128])

                @pl.when(s == last)
                def _tail():
                    # Mask out-of-range lanes of the final (partial) spatial
                    # tile with -inf BEFORE the max (OOB lane data is
                    # unspecified and may be NaN).
                    rem = S - s * ts
                    lane = lax.broadcasted_iota(jnp.int32, x_ref.shape, 2)
                    tile = jnp.where(lane < rem, x_ref[...],
                                     jnp.asarray(-jnp.inf, x_ref.dtype))
                    accumulate(lambda g: tile[:, :, g * 128:(g + 1) * 128])
            else:
                accumulate(lambda g: x_ref[:, :, g * 128:(g + 1) * 128])
        else:
            # ts == S < 128: single spatial step, plain lane reduce (runs once).
            acc_ref[...] = jnp.maximum(acc_ref[...],
                                       jnp.max(x_ref[...], axis=-1))

        @pl.when(s == last)
        def _finalize():
            # Single 128->1 lane reduce (XLU) once per batch tile, then the
            # tiny MXU matmul: (tn, C) @ (C, K) -> (tn, K).
            pooled = jnp.max(acc_ref[...], axis=-1) if chunked else acc_ref[...]
            emb_ref[...] = jnp.dot(
                pooled, ht_ref[...], preferred_element_type=jnp.float32
            ).astype(emb_ref.dtype)

    return kernel


def nmf_forward(x, H, *, max_tile_bytes=8 * 1024 * 1024, max_lane_tile=1024):
    """Replicates NMFModule.forward.

    Args:
      x: (N, C, Hs, Ws) float32, NCHW.
      H: (K, C) float32 projection matrix (nn.Linear weight layout).

    Returns:
      (x, nmf_emb) -- the module's forward returns x unchanged; nmf_emb is the
      kernel's compute, exposed for inspection.
    """
    N, C, Hs, Ws = x.shape
    K, C_h = H.shape
    assert C == C_h, "channel dim of x must match H's second dim"
    S = Hs * Ws
    itemsize = jnp.dtype(x.dtype).itemsize

    x_flat = x.reshape(N, C, S)   # metadata reshape: reduction axis becomes the lane axis
    Ht = H.T                      # (C, K), transposed once outside the kernel

    # ---- spatial (reduction / lane) tile: multiple of 128, <= S ------------
    if S < 128:
        ts = S                                    # full-extent block (always legal)
    else:
        ts = min(max_lane_tile, (S // 128) * 128)
        # Very large C: shrink the lane tile so even a one-row tile fits the budget.
        lane_cap = max(128, (max_tile_bytes // (C * itemsize)) // 128 * 128)
        ts = max(128, min(ts, lane_cap))
    chunked = (ts % 128 == 0)

    # ---- batch (parallel) tile: fill the byte budget -----------------------
    tn = max(1, min(N, max_tile_bytes // (C * ts * itemsize)))
    # v7x megacore: guarantee >= 2 blocks on the parallel axis when N >= 2.
    while tn > 1 and pl.cdiv(N, tn) < 2:
        tn //= 2

    nb = pl.cdiv(N, tn)
    ns = pl.cdiv(S, ts)
    grid = (nb, ns)

    # ---- explicit VMEM budget (v7x physical VMEM is only 64 MiB) -----------
    acc_lanes = 128 if chunked else 1
    x_tile_bytes = tn * C * ts * itemsize
    vmem_need = (2 * x_tile_bytes                                   # double-buffered x tile
                 + tn * C * acc_lanes * 4                           # accumulator scratch
                 + 2 * C * K * jnp.dtype(Ht.dtype).itemsize         # weight (2 bufs, tiny)
                 + 2 * tn * K * 4)                                  # output tile
    vmem_limit = int(min(max(vmem_need + (8 << 20), 32 << 20), 48 << 20))

    kernel = _make_nmf_kernel(S=S, ts=ts, chunked=chunked)

    cost = pl.CostEstimate(
        flops=2 * N * C * K + N * C * S,          # matmul + pooling compares (advisory)
        transcendentals=0,
        bytes_accessed=(x_flat.size * itemsize
                        + Ht.size * jnp.dtype(Ht.dtype).itemsize
                        + N * K * 4),
    )

    emb = pl.pallas_call(
        kernel,
        out_shape=jax.ShapeDtypeStruct((nb, tn, K), jnp.float32),
        grid_spec=pltpu.PrefetchScalarGridSpec(
            num_scalar_prefetch=0,
            grid=grid,
            in_specs=[
                pl.BlockSpec((tn, C, ts), lambda i, s: (i, 0, s)),
                # Constant index_map -> the weight is DMA'd once.
                # TODO(synk): single-buffer it via pipeline_mode=pl.Buffered(1)
                # once verified on the target jax version (saves C*K*4 B VMEM).
                pl.BlockSpec((C, K), lambda i, s: (0, 0)),
            ],
            # (None, tn, K): leading dim squeezed; trailing dims are the full
            # extents of the (nb, tn, K) output, so any tn is a legal block.
            out_specs=pl.BlockSpec((None, tn, K), lambda i, s: (i, 0, 0)),
            scratch_shapes=[
                pltpu.VMEM((tn, C, 128) if chunked else (tn, C), jnp.float32)
            ],
        ),
        compiler_params=pltpu.CompilerParams(
            dimension_semantics=("parallel", "arbitrary"),
            vmem_limit_bytes=vmem_limit,
        ),
        cost_estimate=cost,
    )(x_flat, Ht)

    # Batch-tail rows (if any) are garbage by construction; slice them off.
    nmf_emb = emb.reshape(nb * tn, K)[:N]

    # The PyTorch module's forward returns x unchanged (nmf_emb is computed
    # internally but unused); we expose it so the kernel's work is checkable.
    return x, nmf_emb


if __name__ == "__main__":
    key = jax.random.PRNGKey(0)
    kx, kh = jax.random.split(key)

    N, C, Hs, Ws = 2, 4, 16, 16   # small NCHW input
    K = 8                         # NMF components: H has shape (K, C)

    x = jax.random.normal(kx, (N, C, Hs, Ws), dtype=jnp.float32)
    H = jax.random.normal(kh, (K, C), dtype=jnp.float32)

    out_x, nmf_emb = nmf_forward(x, H)
    out_x = jax.block_until_ready(out_x)
    nmf_emb = jax.block_until_ready(nmf_emb)

    # Reference check (pure JAX): max-pool over spatial, then pooled @ H.T.
    pooled_ref = jnp.max(x.reshape(N, C, -1), axis=-1)
    emb_ref = pooled_ref @ H.T
    assert jnp.allclose(out_x, x), "forward must return x unchanged"
    assert jnp.allclose(nmf_emb, emb_ref, atol=1e-5, rtol=1e-5), "nmf_emb mismatch"

    print("KERNEL_OK")
</pallas_src>

<mosaic_0001>
module attributes {stable_mosaic.version = 11 : i64} {
  func.func @kernel(%arg0: i32, %arg1: i32, %arg2: memref<1x4x256xf32, #tpu.memory_space<vmem>>, %arg3: memref<4x8xf32, #tpu.memory_space<vmem>>, %arg4: memref<1x1x8xf32, #tpu.memory_space<vmem>>, %arg5: memref<1x4x128xf32, #tpu.memory_space<vmem>>) attributes {dimension_semantics = [#tpu.dimension_semantics<parallel>, #tpu.dimension_semantics<arbitrary>], iteration_bounds = array<i64: 2, 1>, scalar_prefetch = 0 : i64, scratch_operands = 1 : i64, tpu.core_type = #tpu.core_type<tc>, window_params = [{transform_indices = @transform_0, window_bounds = array<i64: 1, 4, 256>}, {pipeline_mode = #tpu.pipeline_mode<synchronous>, transform_indices = @transform_1, window_bounds = array<i64: 4, 8>}, {transform_indices = @transform_2, window_bounds = array<i64: 1, 1, 8>}]} {
    %c0_i32 = arith.constant 0 : i32
    %0 = arith.cmpi eq, %arg1, %c0_i32 : i32
    %1 = arith.extui %0 : i1 to i32
    %c0_i32_0 = arith.constant 0 : i32
    %2 = arith.cmpi ne, %1, %c0_i32_0 : i32
    scf.if %2 {
      %cst = arith.constant 0xFF800000 : f32
      %12 = vector.broadcast %cst : f32 to vector<1x4x128xf32>
      %c0_13 = arith.constant 0 : index
      %c0_14 = arith.constant 0 : index
      %c0_15 = arith.constant 0 : index
      %13 = vector.load %arg5[%c0_13, %c0_14, %c0_15] : memref<1x4x128xf32, #tpu.memory_space<vmem>>, vector<1x4x128xf32>
      tpu.vector_store %arg5[%c0_13, %c0_14, %c0_15], %12 {strides = array<i32>} : memref<1x4x128xf32, #tpu.memory_space<vmem>>, vector<1x4x128xf32>,
    } else {
    }
    %c0 = arith.constant 0 : index
    %c0_1 = arith.constant 0 : index
    %c0_2 = arith.constant 0 : index
    %3 = vector.load %arg5[%c0, %c0_1, %c0_2] : memref<1x4x128xf32, #tpu.memory_space<vmem>>, vector<1x4x128xf32>
    %c0_3 = arith.constant 0 : index
    %c0_4 = arith.constant 0 : index
    %c0_5 = arith.constant 0 : index
    %4 = vector.load %arg2[%c0_3, %c0_4, %c0_5] : memref<1x4x256xf32, #tpu.memory_space<vmem>>, vector<1x4x128xf32>
    %5 = arith.maximumf %3, %4 : vector<1x4x128xf32>
    %c0_6 = arith.constant 0 : index
    %c0_7 = arith.constant 0 : index
    %c128 = arith.constant 128 : index
    %6 = vector.load %arg2[%c0_6, %c0_7, %c128] : memref<1x4x256xf32, #tpu.memory_space<vmem>>, vector<1x4x128xf32>
    %7 = arith.maximumf %5, %6 : vector<1x4x128xf32>
    %c0_8 = arith.constant 0 : index
    %c0_9 = arith.constant 0 : index
    %c0_10 = arith.constant 0 : index
    %8 = vector.load %arg5[%c0_8, %c0_9, %c0_10] : memref<1x4x128xf32, #tpu.memory_space<vmem>>, vector<1x4x128xf32>
    tpu.vector_store %arg5[%c0_8, %c0_9, %c0_10], %7 {strides = array<i32>} : memref<1x4x128xf32, #tpu.memory_space<vmem>>, vector<1x4x128xf32>,
    %c0_i32_11 = arith.constant 0 : i32
    %9 = arith.cmpi eq, %arg1, %c0_i32_11 : i32
    %10 = arith.extui %9 : i1 to i32
    %c0_i32_12 = arith.constant 0 : i32
    %11 = arith.cmpi ne, %10, %c0_i32_12 : i32
    scf.if %11 {
      %c0_13 = arith.constant 0 : index
      %c0_14 = arith.constant 0 : index
      %c0_15 = arith.constant 0 : index
      %12 = vector.load %arg5[%c0_13, %c0_14, %c0_15] : memref<1x4x128xf32, #tpu.memory_space<vmem>>, vector<1x4x128xf32>
      %cst = arith.constant dense<0xFF800000> : vector<1x4xf32>
      %13 = vector.multi_reduction <maximumf>, %12, %cst [2] : vector<1x4x128xf32> to vector<1x4xf32>
      %c0_16 = arith.constant 0 : index
      %c0_17 = arith.constant 0 : index
      %14 = vector.load %arg3[%c0_16, %c0_17] : memref<4x8xf32, #tpu.memory_space<vmem>>, vector<4x8xf32>
      %cst_18 = arith.constant dense<0.000000e+00> : vector<1x8xf32>
      %15 = tpu.matmul %13, %14, %cst_18 {dimension_numbers = #tpu.dot_dimension_numbers<[1], [0], [0], [1], [0, 0, 1, 1], [], []>} : vector<1x4xf32>, vector<4x8xf32>, vector<1x8xf32> -> vector<1x8xf32>
      %c0_19 = arith.constant 0 : index
      %c0_20 = arith.constant 0 : index
      %c0_21 = arith.constant 0 : index
      %16 = vector.load %arg4[%c0_19, %c0_20, %c0_21] : memref<1x1x8xf32, #tpu.memory_space<vmem>>, vector<1x1x8xf32>
      %17 = vector.shape_cast %16 : vector<1x1x8xf32> to vector<1x8xf32>
      %18 = vector.shape_cast %15 : vector<1x8xf32> to vector<1x1x8xf32>
      tpu.vector_store %arg4[%c0_19, %c0_20, %c0_21], %18 {strides = array<i32>} : memref<1x1x8xf32, #tpu.memory_space<vmem>>, vector<1x1x8xf32>,
    } else {
    }
    return
  }
  func.func @transform_0(%arg0: i32, %arg1: i32) -> (i32, i32, i32) {
    %c0_i32 = arith.constant 0 : i32
    %c0_i32_0 = arith.constant 0 : i32
    return %arg0, %c0_i32, %arg1 : i32, i32, i32
  }
  func.func @transform_1(%arg0: i32, %arg1: i32) -> (i32, i32) {
    %c0_i32 = arith.constant 0 : i32
    %c0_i32_0 = arith.constant 0 : i32
    %c0_i32_1 = arith.constant 0 : i32
    return %c0_i32, %c0_i32_0 : i32, i32
  }
  func.func @transform_2(%arg0: i32, %arg1: i32) -> (i32, i32, i32) {
    %c0_i32 = arith.constant 0 : i32
    %c0_i32_0 = arith.constant 0 : i32
    %c0_i32_1 = arith.constant 0 : i32
    return %arg0, %c0_i32, %c0_i32_0 : i32, i32, i32
  }
}

</mosaic_0001>

<bundles_post_ra>
// kernel: tpu_custom_call.1
= control target key start
LH: loop header
LB: loop body
LE: loop exit
PB: predicated region body
PF: predicated region fallthrough
CT: control target
= control target key end

     0   :  { %7 = vsyncpa [#allocation4], 0  ;;  %s878_s0 = inlined_call_operand.hbm [shape: f32[2,4,256], index: 0, kind: input, shape index: {}]   ;;  %s879_s1 = inlined_call_operand.hbm [shape: f32[4,8], index: 1, kind: input, shape index: {}]   ;;  %s880_s2 = inlined_call_operand.hbm [shape: f32[2,1,8], index: 2, kind: output, shape index: {}]  }
   0x1   :  { %9 = vsyncpa [#allocation4 + $0x1], 0 }
   0x2   :  { %10 = vsyncpa [#allocation7], 0 }
   0x3   :  { %11 = vsyncpa [#allocation5], 0 }
   0x4   :  { %13 = vsyncpa [#allocation5 + $0x1], 0  ;;  %s661_s9 = smov 0   ;;  %s663_s10 = smov 0  }
   0x5   :  { %s665_s11 = smov 0   ;;  %s667_s12 = smov 0  }
   0x6   :  { %s669_s13 = smov 0   ;;  %s671_s14 = smov 0  }
   0x7 LB: > { %s394_s15 = sadd.s32 4294967295, %s638_s14   ;;  %s395_s16 = sadd.s32 4294967294, %s638_s14   ;;  %s638_s14 = sphi %s671_s14, %s19_s14   ;;  %s634_s13 = sphi %s669_s13, %s905_s13   ;;  %s630_s12 = sphi %s667_s12, %s904_s12   ;;  %s626_s11 = sphi %s665_s11, %s903_s11   ;;  %s622_s10 = sphi %s663_s10, %s902_s10   ;;  %s618_s9 = sphi %s661_s9, %s901_s9  }
   0x8   : > { %p53_p0 = scmp.ne.s32.totalorder %s622_s10, %s618_s9  ;;  %p695_p1 = scmp.eq.s32.totalorder %s394_s15, 0 }
   0x9   : > { %p699_p2 = scmp.eq.s32.totalorder %s394_s15, 1  ;;  %p104_p3 = scmp.eq.s32.totalorder %s395_s16, 1 }
   0xa   : > { %s885_s17 = scalar_select %p695_p1, 1, 0 }
   0xb   : > { %s886_s18 = scalar_select %p699_p2, 1, 0 }
   0xc   : > { %p705_p4 = por %p695_p1, %p53_p0  ;;  %p396_p5 = scmp.ge.s32.totalorder %s638_s14, 1 }
   0xd   : > { %p710_p6 = por %p104_p3, %p53_p0  ;;  %p111_p7 = scmp.lt.s32.totalorder %s638_s14, 3 }
   0xe   : > { %s887_s19 = scalar_select %p705_p4, 1, 0 }
   0xf   : > { %s888_s20 = scalar_select %p710_p6, 1, 0 }
  0x10   : > { %p715_p8 = pnand %p396_p5, %p111_p7  ;;  %s640_s22 = smov [#allocation6]  }
  0x11   : > { %s124_s23 = sshll.u32 %s640_s22, 4  ;;  %s31_s25 = sadd.s32 1, %s634_s13  ;;  %s125_s23 = int_to_ptr.vmem [resolvable:$true] %s124_s23 }
  0x12   : > { %s889_s21 = scalar_select %p715_p8, 1, 0 }
  0x13   : > { %p426_p10 = pneg %p715_p8  ;;  %s40_s26 = sadd.s32 1, %s626_s11 }
  0x14   : > { %p730_p12 = scmp.ge.s32.totalorder %s31_s25, 2  ;;  %s494_s30 = scalar_lea.hbm %s879_s1, 64 }
  0x15   : > { %p724_p11 = pnand %p426_p10, %p695_p1  ;;  %p495_p13 = scmp.ne.s32.totalorder %s879_s1, %s494_s30 }
  0x16   : > { %s891_s27 = scalar_select %p730_p12, 1, 0 }
  0x17   : > { %p496_p0 = pneg %p724_p11  ;;  %p501_p7 = scmp.lt.u32.totalorder %s494_s30, %s879_s1 }
  0x19   : > { %p497_p3 = pnand %p496_p0, %p495_p13 }
  0x1b   : > { %p498_p5 = pneg %p497_p3 }
  0x1d   : > { %p503_p10 = pnand %p501_p7, %p498_p5 }
  0x1f   : > { %506 = shalt.err (!%p503_p10)
}
  0x20   : > { %s507_s7 = scalar_lea.vmem %s125_s23, 64  ;;  %p515_p4 = scmp.lt.s32.totalorder %s125_s23, %s125_s23 }
  0x21   : > { %p508_p9 = scmp.ne.s32.totalorder %s125_s23, %s507_s7  ;;  %p516_p8 = scmp.lt.s32.totalorder %s507_s7, %s507_s7 }
  0x23   : > { %p510_p6 = pnand %p508_p9, %p496_p0  ;;  %p517_p2 = por %p516_p8, %p515_p4 }
  0x25   : > { %p511_p1 = pneg %p510_p6 }
  0x27   : > { %p518_p12 = pnand %p517_p2, %p511_p1 }
  0x29   : > { %521 = shalt.err (!%p518_p12)
}
  0x2a   : > { %429 = dma.hbm_to_vmem [thread:$0]  (!%p724_p11), %s879_s1, 64, %s125_s23, [#allocation7]  }
  0x2b   : > { %p892_p4 = scmp.ne.s32.totalorder %s891_s27, 0  ;;  %p47_p1 = scmp.ne.s32.totalorder %s626_s11, %s622_s10 }
  0x2c   : > { %p48_p2 = scmp.eq.s32.totalorder %s638_s14, 0  ;;  %p439_p6 = scmp.lt.s32.totalorder %s638_s14, 2 }
  0x2d   : > { %s907_s25 = smov (%p892_p4, %s31_s25), 0  ;;  %p893_p12 = scmp.ne.s32.totalorder %s886_s18, 0 }
  0x2e   : > { %s35_s16 = ssub.s32 %s634_s13, %s907_s25  ;;  %p49_p9 = por %p48_p2, %p47_p1 }
  0x2f   : > { %p38_p8 = scmp.eq.s32.totalorder %s35_s16, 0  ;;  %p762_p13 = por %p893_p12, %p47_p1 }
  0x30   : > { %s135_s24 = sand.u32 1, %s626_s11   ;;  %s410_s27 = sshll.u32 %s634_s13, 7 }
  0x31   : > { %s770_s28 = scalar_select %p38_p8, %s626_s11, %s40_s26  }
  0x32   : > { %s399_s23 = sshll.u32 %s135_s24, 3  ;;  %s776_s3 = scalar_lea.hbm %s878_s0, %s410_s27 }
  0x33   : > { %s139_s18 = scalar_lea.vmem [#allocation3], %s399_s23  ;;  %p780_p11 = pnand %p439_p6, %p49_p9 }
  0x34   : > { %s149_s4 = sshll.u32 %s139_s18, 4  ;;  %s136_s26 = scalar_lea.sflag [#allocation4], %s135_s24  ;;  %s778_s4 = int_to_ptr.vmem [resolvable:$true] %s149_s4 }
  0x35   : > { %s522_s6 = scalar_lea.hbm %s776_s3, 128  ;;  %p524_p3 = pneg %p780_p11 }
  0x36   : > { %p523_p0 = scmp.ne.s32.totalorder %s776_s3, %s522_s6  ;;  %s527_s15 = scalar_lea.hbm %s878_s0, 256 }
  0x37   : > { %p528_p10 = scmp.lt.u32.totalorder %s776_s3, %s878_s0  ;;  %p529_p4 = scmp.lt.u32.totalorder %s527_s15, %s522_s6 }
  0x38   : > { %p525_p5 = pnand %p524_p3, %p523_p0  ;;  %p531_p2 = scmp.lt.u32.totalorder %s522_s6, %s776_s3 }
  0x39   : > { %p530_p1 = por %p529_p4, %p528_p10 }
  0x3a   : > { %p526_p7 = pneg %p525_p5 }
  0x3b   : > { %p532_p6 = por %p531_p2, %p530_p1 }
  0x3d   : > { %p533_p8 = pnand %p532_p6, %p526_p7 }
  0x3f   : > { %536 = shalt.err (!%p533_p8)
}
  0x40   : > { %s537_s24 = scalar_lea.vmem %s778_s4, 128  ;;  %s641_s27 = smov [#allocation3]  }
  0x41   : > { %p538_p9 = scmp.ne.s32.totalorder %s778_s4, %s537_s24  ;;  %s542_s29 = sshll.u32 %s641_s27, 4  ;;  %s543_s29 = int_to_ptr.vmem [resolvable:$false] %s542_s29 }
  0x42   : > { %s544_s30 = scalar_lea.vmem %s543_s29, 256  ;;  %p545_p5 = scmp.lt.s32.totalorder %s778_s4, %s543_s29 }
  0x43   : > { %p540_p12 = pnand %p538_p9, %p524_p3  ;;  %p546_p10 = scmp.lt.s32.totalorder %s544_s30, %s537_s24 }
  0x45   : > { %p541_p0 = pneg %p540_p12  ;;  %p547_p4 = por %p546_p10, %p545_p5 }
  0x47   : > { %p548_p1 = pnand %p547_p4, %p541_p0 }
  0x49   : > { %551 = shalt.err (!%p548_p1)
}
  0x4a   : > { %433 = dma.hbm_to_vmem [thread:$0]  (!%p780_p11), %s776_s3, 128, %s778_s4, %s136_s26  }
  0x4b   : > { %p896_p7 = scmp.ne.s32.totalorder %s889_s21, 0 }
  0x4c   : > { %s812_s18 = sand.u32 (!%p896_p7), 1, %s622_s10   ;;  %p897_p3 = scmp.ne.s32.totalorder (!%p896_p7), %s887_s19, 0 }
  0x4d   : > { %158 = sbr.rel (%p896_p7) target bundleno = 480 (0x1e0), region = 28  ;;  %s403_s6 = sshll.u32 (!%p896_p7), %s812_s18, 3 }
  0x4e   : > { %s161_s7 = scalar_lea.sflag (!%p896_p7), [#allocation4], %s812_s18  ;;  %s164_s8 = scalar_lea.vmem (!%p896_p7), [#allocation3], %s403_s6 }
  0x54   : > { %605 = dma.done.wait (%p897_p3), %s161_s7, 128  }
  0x55   : > { %607 = vsyncadd (%p897_p3), %s161_s7, 4294967168  ;;  %p898_p2 = scmp.ne.s32.totalorder %s885_s17, 0 }
  0x57   : > { %609 = dma.done.wait (%p898_p2), [#allocation7], 64  }
  0x58   : > { %611 = vsyncadd (%p898_p2), [#allocation7], 4294967232  ;;  %v642_v0 = vmov -inf   ;;  %v195_v1 = vld [vmem:[%s164_s8] sm:$0xf]  ;;  %vm204_vm0 = vcmask 1043456   ;;  %v210_v10 = vlaneseq }
  0x59   : > { %193 = vst [vmem:[#allocation2] sm:$0xf] %v642_v0  ;;  %v197_v3 = vld [vmem:[%s164_s8 + $0x4] sm:$0xf]  ;;  %v643_v8 = vmov 0.0   ;;  %vm644_vm1 = vmmov 0  }
  0x5a   : > { %413 = vmatprep.subr.mxu0 %v643_v8  ;;  %v208_v9 = vld [vmem:[#allocation6] sm:$0xf]  ;;  %415 = vmatprep.mubr.msk.f32.mxu0 %vm644_vm1, %v643_v8  ;;  %v211_v11 = vand.u32 127, %v210_v10  ;;  %v213_v12 = vshrl.u32 %v210_v10, 7  ;;  %vm216_vm2 = vcmask 31744   ;;  %s407_s17 = sshll.u32 %s630_s12, 4 }
  0x5b   : > { %414 = vmatpush3.msk.msra.mxu0 %vm204_vm0, %v208_v9  ;;  %s187_s19 = scalar_lea.vmem [#allocation8], %s812_s18  ;;  %vm292_vm3 = vcmask 57344   ;;  %s829_s5 = scalar_lea.hbm %s880_s2, %s407_s17 }
  0x5c   : > { %v214_v13 = vsub.s32 %v211_v11, %v213_v12  ;;  %s307_s21 = sshll.u32 %s187_s19, 4  ;;  %s295_s26 = scalar_lea.sflag [#allocation5], %s812_s18  ;;  %s831_s21 = int_to_ptr.vmem [resolvable:$true] %s307_s21 }
  0x5d   : > { %s552_s15 = scalar_lea.vmem %s831_s21, 16  ;;  %s645_s12 = smov [#allocation8]  }
  0x5e   : > { %p553_p11 = scmp.ne.s32.totalorder %s831_s21, %s552_s15  ;;  %s556_s16 = sshll.u32 %s645_s12, 4  ;;  %s557_s16 = int_to_ptr.vmem [resolvable:$false] %s556_s16 }
  0x5f   : > { %s558_s23 = scalar_lea.vmem %s557_s16, 32  ;;  %p559_p9 = scmp.lt.s32.totalorder %s831_s21, %s557_s16 }
  0x60   : > { %v194_v2 = vld [vmem:[#allocation2] sm:$0xf]  ;;  %p554_p6 = pnand %p553_p11, %p762_p13  ;;  %p560_p12 = scmp.lt.s32.totalorder %s558_s23, %s552_s15 }
  0x61   : > { %v196_v4 = vmax.f32 %v194_v2, %v195_v1 }
  0x62   : > { %p555_p8 = pneg %p554_p6  ;;  %p561_p0 = por %p560_p12, %p559_p9 }
  0x63   : > { %v198_v5 = vmax.f32 %v196_v4, %v197_v3 }
  0x64   : > { %p562_p5 = pnand %p561_p0, %p555_p8 }
  0x65   : > { %199 = vst [vmem:[#allocation2] sm:$0xf] %v198_v5 }
  0x6c   : > { %v203_v6 = vld [vmem:[#allocation2] sm:$0xf] }
  0x6d   : > { %v205_v7 = vsel %vm204_vm0, %v203_v6, -inf }
  0x6e   : > { %206 = vmax.xlane.f32.xlu0 %v205_v7 }
  0xfb   : > { %v207_v14 = vpop.xlane.xlu0 %206 }
  0xfc   : > { %v215_v15 = vrot.slane %v207_v14, %v214_v13 }
  0xfe   : > { %416 = vmatmul.mubr.msk.f32.vlgmr.msra.gmra.mrb[0].mxu0 %vm216_vm2, %v215_v15 }
 0x1d1   : > { %v288_v16 = vpop.f32.mrb[0].mxu0 }
 0x1d2   : > { %293 = vst.msk [vmem:[%s187_s19] sm:$0x1] %vm292_vm3, %v288_v16  ;;  %v417_v17 = vpop.f32.mrb[1].mxu0 }
 0x1d3   : > { %565 = shalt.err (!%p562_p5)
}
 0x1d4   : > { %s566_s24 = scalar_lea.hbm %s829_s5, 16  ;;  %s570_s30 = scalar_lea.hbm %s880_s2, 32 }
 0x1d5   : > { %p567_p10 = scmp.ne.s32.totalorder %s829_s5, %s566_s24  ;;  %p571_p7 = scmp.lt.u32.totalorder %s829_s5, %s880_s2 }
 0x1d6   : > { %p572_p3 = scmp.lt.u32.totalorder %s570_s30, %s566_s24  ;;  %p574_p11 = scmp.lt.u32.totalorder %s566_s24, %s829_s5 }
 0x1d7   : > { %p568_p4 = pnand %p567_p10, %p762_p13 }
 0x1d8   : > { %p573_p2 = por %p572_p3, %p571_p7 }
 0x1d9   : > { %p569_p1 = pneg %p568_p4 }
 0x1da   : > { %p575_p6 = por %p574_p11, %p573_p2 }
 0x1dc   : > { %p576_p8 = pnand %p575_p6, %p569_p1 }
 0x1de   : > { %579 = shalt.err (!%p576_p8)
}
 0x1df   : > { %424 = dma.vmem_to_hbm [thread:$0]  (%p762_p13), %s831_s21, 16, %s829_s5, %s295_s26  }
 0x1e0 PF: > { %s319_s7 = sand.u32 1, %s618_s9   ;;  %p899_p9 = scmp.ne.s32.totalorder %s888_s20, 0 }
 0x1e1   : > { %p900_p12 = scmp.ge.s32.totalorder %s638_s14, 2  ;;  %s320_s8 = scalar_lea.sflag [#allocation5], %s319_s7 }
 0x1e3   : > { %p435_p0 = pnand %p900_p12, %p899_p9 }
 0x1e5   : > { %613 = dma.done.wait (!%p435_p0), %s320_s8, 16  }
 0x1e6   : > { %615 = vsyncadd (!%p435_p0), %s320_s8, 4294967280  ;;  %s19_s14 = sadd.s32 1, %s638_s14   ;;  %s901_s9 = smov %s622_s10 }
 0x1e7   : > { %p16_p5 = scmp.ge.s32.totalorder %s19_s14, 4   ;;  %s902_s10 = smov %s626_s11 }
 0x1e8   : > { %s903_s11 = smov %s770_s28  ;;  %s904_s12 = smov %s634_s13 }
 0x1e9   : > { %s905_s13 = smov %s907_s25  ;;  %18 = sbr.rel (!%p16_p5) target bundleno = 7 (0x7), region = 85 }
 0x1f0   :  { %324 = vsyncpa [#allocation4], 1 }
 0x1f1   :  { %326 = vsyncpa [#allocation4 + $0x1], 1 }
 0x1f2   :  { %327 = vsyncpa [#allocation7], 1 }
 0x1f3   :  { %328 = vsyncpa [#allocation5], 1 }
 0x1f4   :  { %330 = vsyncpa [#allocation5 + $0x1], 1 }

</bundles_post_ra>
